<compile_context>
chip_gen: v7x
topology: tpu7x:2x2x1
jax: 0.10.0
libtpu: 0.0.40
codegen_flags: <defaults>
</compile_context>

<pallas_src>
import jax
import jax.numpy as jnp
from jax.experimental import pallas as pl
from jax.experimental.pallas import tpu as pltpu


def _round_up(x, m):
    return ((x + m - 1) // m) * m


def _padded_rows(rows, itemsize):
    # VMEM sublane tile: 8 rows for 4-byte dtypes, 16 for 2-byte, 32 for 1-byte.
    tile = 8 * max(1, 4 // max(1, itemsize))
    return _round_up(rows, tile)


def _vmem_budgets():
    """(working-set budget, vmem_limit_bytes) derived per TPU generation."""
    phys = 64 * 1024 * 1024  # fall back to v7x (smallest current per-TC VMEM)
    try:
        info = pltpu.get_tpu_info()
        phys = int(getattr(info, "vmem_capacity_bytes", phys)) or phys
    except Exception:
        pass
    phys = max(phys, 32 * 1024 * 1024)
    # Diminishing returns past ~2-4 MiB blocks; prioritize a safe cap.
    budget = min(32 * 1024 * 1024, max(8 * 1024 * 1024, phys // 2 - 4 * 1024 * 1024))
    limit = min(int(phys * 3 // 4), budget + 16 * 1024 * 1024)
    return budget, limit


def _fold_factor(heads, du, L):
    """Fold a factor of `du` into the row axis when heads < 8, but only if the
    lane axis stays a multiple of 128 (keeps stores lane-dense)."""
    if heads >= 8 or heads % 8 == 0:
        return 1
    for g in range(2, du + 1):
        if du % g == 0 and (L // g) % 128 == 0 and (heads * g) % 8 == 0:
            return g
    return 1


def weightup_kernel(mean_ref, va_ref, w_ref, ab_ref, out_ref):
    # mean/va/w/out: (hb, lane_block) tiles in their native dtypes.
    # ab           : (hb, 2) f32 per-row scalars [a, b], a = s/(s+1), b = 1/(s+1).
    a = ab_ref[:, 0:1]
    b = ab_ref[:, 1:2]
    m = mean_ref[...].astype(jnp.float32)
    v = va_ref[...].astype(jnp.float32)
    w = w_ref[...].astype(jnp.float32)
    out_ref[...] = (a * m + b * (w * v)).astype(out_ref.dtype)


@jax.jit
def updatemean_forward(mean, va, scumu, w):
    """Pallas implementation of updatemean.forward(mean, va, scumu).

    mean, va, w : (heads, duser, daction)   (any float dtype; kept on the wire)
    scumu       : (heads,) per-head cumulative count / weight
    returns     : (heads, duser, daction), same dtype as `mean`
    """
    heads, du, da = mean.shape
    out_dtype = mean.dtype
    L = du * da

    # ---- 2-D lane-dense layout (free reshapes; no pads, no dtype copies) ----
    g = _fold_factor(heads, du, L)
    R, C = heads * g, L // g
    m2 = mean.reshape(R, C)
    v2 = va.reshape(R, C)
    w2 = w.reshape(R, C)

    # ---- per-head scalar math hoisted out of the element path ----
    s = scumu.astype(jnp.float32)
    a = s / (s + 1.0)
    b = 1.0 / (s + 1.0)
    ab = jnp.stack([a, b], axis=-1)            # (heads, 2) f32
    if g > 1:
        ab = jnp.repeat(ab, g, axis=0)         # (R, 2): row r belongs to head r // g

    # ---- block / grid sizing from the per-generation VMEM budget ----
    ws_budget, vmem_limit = _vmem_budgets()
    itemsizes = [jnp.dtype(x.dtype).itemsize for x in (m2, v2, w2)]
    itemsizes.append(jnp.dtype(out_dtype).itemsize)

    # rows per block: whole row axis if it fits at the minimal lane block.
    min_lane = min(C, 128)
    bytes_per_row_min = 2 * min_lane * sum(itemsizes)        # double-buffered
    hb_cap = max(8, ws_budget // max(1, bytes_per_row_min))
    if R <= hb_cap:
        hb = R                                               # block == full dim (legal)
    else:
        hb = max(8, (min(hb_cap, R) // 8) * 8)               # multiple of 8

    # lanes per block: multiple of 128 (or the full axis), <= ~4 MiB per array
    # and within the double-buffered working-set budget.
    bytes_per_lane = 2 * sum(_padded_rows(hb, it) * it for it in itemsizes)
    lane_cap = max(128, min(ws_budget // max(1, bytes_per_lane),
                            (4 * 1024 * 1024) // max(1, hb * 4)))
    lane_cap = max(128, (lane_cap // 128) * 128)
    lane_block = C if C <= lane_cap else lane_cap

    grid_h = pl.cdiv(R, hb)
    grid_l = pl.cdiv(C, lane_block)

    # v7x has 2 TensorCores: a non-trivial stream should have >= 2 parallel steps.
    if grid_h * grid_l < 2:
        if C >= 256:
            lane_block = _round_up(pl.cdiv(C, 2), 128)
            grid_l = pl.cdiv(C, lane_block)
        elif R >= 16:
            hb = _round_up(pl.cdiv(R, 2), 8)
            grid_h = pl.cdiv(R, hb)

    big = pl.BlockSpec((hb, lane_block), lambda i, j: (i, j))
    col = pl.BlockSpec((hb, 2), lambda i, j: (i, 0))

    out2 = pl.pallas_call(
        weightup_kernel,
        out_shape=jax.ShapeDtypeStruct((R, C), out_dtype),
        grid=(grid_h, grid_l),
        in_specs=[big, big, big, col],
        out_specs=big,
        compiler_params=pltpu.CompilerParams(
            dimension_semantics=("parallel", "parallel"),
            vmem_limit_bytes=vmem_limit,
        ),
    )(m2, v2, w2, ab)

    return out2.reshape(heads, du, da)


if __name__ == "__main__":
    # ---- main check: the module's demo-sized shapes ----
    heads, duser, daction = 4, 8, 16
    key = jax.random.PRNGKey(0)
    k_mean, k_va, k_scumu, k_w = jax.random.split(key, 4)

    mean = jax.random.normal(k_mean, (heads, duser, daction), dtype=jnp.float32)
    va = jax.random.normal(k_va, (heads, duser, daction), dtype=jnp.float32)
    scumu = jax.random.uniform(k_scumu, (heads,), dtype=jnp.float32,
                               minval=1.0, maxval=10.0)
    w = jax.random.normal(k_w, (heads, duser, daction), dtype=jnp.float32) * 0.1

    s3 = scumu.reshape(heads, 1, 1)
    ref = (s3 * mean + w * va) / (s3 + 1.0)

    out = updatemean_forward(mean, va, scumu, w)
    jax.block_until_ready(out)
    assert out.shape == (heads, duser, daction) and out.dtype == mean.dtype
    assert jnp.allclose(out, ref, atol=1e-5, rtol=1e-5)

    # ---- extra check: sublane-fold path + >=2 grid steps (heads<8, wide lanes) ----
    h2, du2, da2 = 4, 8, 256
    k1, k2, k3, k4 = jax.random.split(jax.random.PRNGKey(1), 4)
    mean_f = jax.random.normal(k1, (h2, du2, da2), dtype=jnp.float32)
    va_f = jax.random.normal(k2, (h2, du2, da2), dtype=jnp.float32)
    sc_f = jax.random.uniform(k3, (h2,), dtype=jnp.float32, minval=1.0, maxval=10.0)
    w_f = jax.random.normal(k4, (h2, du2, da2), dtype=jnp.float32) * 0.1
    s3_f = sc_f.reshape(h2, 1, 1)
    ref_f = (s3_f * mean_f + w_f * va_f) / (s3_f + 1.0)
    out_f = updatemean_forward(mean_f, va_f, sc_f, w_f)
    jax.block_until_ready(out_f)
    assert jnp.allclose(out_f, ref_f, atol=1e-5, rtol=1e-5)

    # ---- extra check: bf16 stays bf16 on the wire (in-kernel f32 compute) ----
    mean_b = mean_f.astype(jnp.bfloat16)
    va_b = va_f.astype(jnp.bfloat16)
    w_b = w_f.astype(jnp.bfloat16)
    out_b = updatemean_forward(mean_b, va_b, sc_f, w_b)
    jax.block_until_ready(out_b)
    assert out_b.dtype == jnp.bfloat16
    ref_b = (s3_f * mean_b.astype(jnp.float32)
             + w_b.astype(jnp.float32) * va_b.astype(jnp.float32)) / (s3_f + 1.0)
    assert jnp.allclose(out_b.astype(jnp.float32), ref_b, atol=3e-2, rtol=3e-2)

    print("KERNEL_OK")
</pallas_src>

<mosaic_0001>
module attributes {stable_mosaic.version = 11 : i64} {
  func.func @weightup_kernel(%arg0: i32, %arg1: i32, %arg2: memref<4x128xf32, #tpu.memory_space<vmem>>, %arg3: memref<4x128xf32, #tpu.memory_space<vmem>>, %arg4: memref<4x128xf32, #tpu.memory_space<vmem>>, %arg5: memref<4x2xf32, #tpu.memory_space<vmem>>, %arg6: memref<4x128xf32, #tpu.memory_space<vmem>>) attributes {dimension_semantics = [#tpu.dimension_semantics<parallel>, #tpu.dimension_semantics<parallel>], iteration_bounds = array<i64: 1, 1>, scalar_prefetch = 0 : i64, scratch_operands = 0 : i64, tpu.core_type = #tpu.core_type<tc>, window_params = [{transform_indices = @transform_0, window_bounds = array<i64: 4, 128>}, {transform_indices = @transform_1, window_bounds = array<i64: 4, 128>}, {transform_indices = @transform_2, window_bounds = array<i64: 4, 128>}, {transform_indices = @transform_3, window_bounds = array<i64: 4, 2>}, {transform_indices = @transform_4, window_bounds = array<i64: 4, 128>}]} {
    %c0 = arith.constant 0 : index
    %c0_0 = arith.constant 0 : index
    %0 = vector.load %arg5[%c0, %c0_0] : memref<4x2xf32, #tpu.memory_space<vmem>>, vector<4x1xf32>
    %c0_1 = arith.constant 0 : index
    %c1 = arith.constant 1 : index
    %1 = vector.load %arg5[%c0_1, %c1] : memref<4x2xf32, #tpu.memory_space<vmem>>, vector<4x1xf32>
    %c0_2 = arith.constant 0 : index
    %c0_3 = arith.constant 0 : index
    %2 = vector.load %arg2[%c0_2, %c0_3] : memref<4x128xf32, #tpu.memory_space<vmem>>, vector<4x128xf32>
    %c0_4 = arith.constant 0 : index
    %c0_5 = arith.constant 0 : index
    %3 = vector.load %arg3[%c0_4, %c0_5] : memref<4x128xf32, #tpu.memory_space<vmem>>, vector<4x128xf32>
    %c0_6 = arith.constant 0 : index
    %c0_7 = arith.constant 0 : index
    %4 = vector.load %arg4[%c0_6, %c0_7] : memref<4x128xf32, #tpu.memory_space<vmem>>, vector<4x128xf32>
    %5 = vector.broadcast %0 : vector<4x1xf32> to vector<4x128xf32>
    %6 = arith.mulf %5, %2 : vector<4x128xf32>
    %7 = arith.mulf %4, %3 : vector<4x128xf32>
    %8 = vector.broadcast %1 : vector<4x1xf32> to vector<4x128xf32>
    %9 = arith.mulf %8, %7 : vector<4x128xf32>
    %10 = arith.addf %6, %9 : vector<4x128xf32>
    %c0_8 = arith.constant 0 : index
    %c0_9 = arith.constant 0 : index
    %11 = vector.load %arg6[%c0_8, %c0_9] : memref<4x128xf32, #tpu.memory_space<vmem>>, vector<4x128xf32>
    tpu.vector_store %arg6[%c0_8, %c0_9], %10 {strides = array<i32>} : memref<4x128xf32, #tpu.memory_space<vmem>>, vector<4x128xf32>,
    return
  }
  func.func @transform_0(%arg0: i32, %arg1: i32) -> (i32, i32) {
    %c0_i32 = arith.constant 0 : i32
    return %arg0, %arg1 : i32, i32
  }
  func.func @transform_1(%arg0: i32, %arg1: i32) -> (i32, i32) {
    %c0_i32 = arith.constant 0 : i32
    return %arg0, %arg1 : i32, i32
  }
  func.func @transform_2(%arg0: i32, %arg1: i32) -> (i32, i32) {
    %c0_i32 = arith.constant 0 : i32
    return %arg0, %arg1 : i32, i32
  }
  func.func @transform_3(%arg0: i32, %arg1: i32) -> (i32, i32) {
    %c0_i32 = arith.constant 0 : i32
    %c0_i32_0 = arith.constant 0 : i32
    return %arg0, %c0_i32 : i32, i32
  }
  func.func @transform_4(%arg0: i32, %arg1: i32) -> (i32, i32) {
    %c0_i32 = arith.constant 0 : i32
    return %arg0, %arg1 : i32, i32
  }
}

</mosaic_0001>

<bundles_post_ra>
// kernel: updatemean_forward.1
= control target key start
LH: loop header
LB: loop body
LE: loop exit
PB: predicated region body
PF: predicated region fallthrough
CT: control target
= control target key end

     0   :  { %v43_v0 = vmov 0   ;;  %v44_v2 = vmov 1   ;;  %s85_s3 = inlined_call_operand.vmem [shape: f32[4,2], index: 3, kind: input, shape index: {}]   ;;  %s86_s1 = inlined_call_operand.vmem [shape: f32[4,128], index: 1, kind: input, shape index: {}]   ;;  %s87_s2 = inlined_call_operand.vmem [shape: f32[4,128], index: 2, kind: input, shape index: {}]   ;;  %s88_s0 = inlined_call_operand.vmem [shape: f32[4,128], index: 0, kind: input, shape index: {}]   ;;  %s89_s4 = inlined_call_operand.vmem [shape: f32[4,128], index: 4, kind: output, shape index: {}]  }
   0x1   :  { %41 = vset.pattern.permute.xlu0 %v43_v0  ;;  %v17_v1 = vld [vmem:[%s85_s3] sm:$0xf] }
   0x2   :  { %23 = vperm.xlu0 %41, %v17_v1   ;;  %v19_v3 = vld [vmem:[%s86_s1] sm:$0xf] }
   0x3   :  { %v20_v4 = vld [vmem:[%s87_s2] sm:$0xf] }
   0x4   :  { %v27_v6 = vmul.f32 %v20_v4, %v19_v3  ;;  %v18_v7 = vld [vmem:[%s88_s0] sm:$0xf] }
   0x6   :  { %42 = vset.pattern.permute.xlu0 %v44_v2 }
   0x7   :  { %29 = vperm.xlu0 %42, %v17_v1  }
  0x81   :  { %v24_v5 = vpop.permute.xlu0 %23 }
  0x82   :  { %v26_v9 = vmul.f32 %v24_v5, %v18_v7 }
  0x86   :  { %v30_v8 = vpop.permute.xlu0 %29 }
  0x87   :  { %v32_v10 = vmul.f32 %v30_v8, %v27_v6 }
  0x89   :  { %v33_v11 = vadd.f32 %v32_v10, %v26_v9 }
  0x8b   :  { %34 = vst [vmem:[%s89_s4] sm:$0xf] %v33_v11 }

</bundles_post_ra>
